<compile_context>
chip_gen: v7x
topology: tpu7x:2x2x1
jax: 0.10.0
libtpu: 0.0.40
codegen_flags: <defaults>
</compile_context>

<pallas_src>
import functools

import jax
import jax.numpy as jnp
from jax.experimental import pallas as pl
from jax.experimental.pallas import tpu as pltpu


def disc_fc_kernel(x_ref, w1_ref, b1_ref, w2_ref, b2_ref, w3_ref, b3_ref, o_ref):
    """One batch tile of the full MLP (weights are VMEM-resident across the grid).

    NOTE: rows of the padded final partial batch tile contain unspecified data;
    they flow through the row-independent matmuls / exp and land only in the
    tail of the last lane-dense output row, which the wrapper slices off.  They
    can never contaminate valid rows — do not "fix" this by masking here.
    """
    x = x_ref[...]                                               # (TB, 784) f32/bf16

    # Layer 1: Linear(784 -> 64) + LeakyReLU(0.2); f32 accumulation on the MXU.
    h = jnp.dot(x, w1_ref[...], preferred_element_type=jnp.float32) + b1_ref[...]
    h = jnp.where(h > 0, h, 0.2 * h)

    # Layer 2: Linear(64 -> 16) + LeakyReLU(0.2)
    h = jnp.dot(h, w2_ref[...], preferred_element_type=jnp.float32) + b2_ref[...]
    h = jnp.where(h > 0, h, 0.2 * h)

    # Layer 3: Linear(16 -> 1) + Sigmoid, computed transposed so the batch ends
    # up on the lane axis:  (1,16) . (TB,16)^T -> (1, TB)   (lane-dense store).
    z = jax.lax.dot_general(
        w3_ref[...], h, (((1,), (1,)), ((), ())),
        preferred_element_type=jnp.float32) + b3_ref[...]        # (1, TB)
    ez = jnp.exp(-jnp.abs(z))                                    # stable sigmoid
    o_ref[0] = jnp.where(z >= 0, 1.0 / (1.0 + ez), ez / (1.0 + ez))


@functools.partial(jax.jit, static_argnames=("input_size", "tb"))
def discriminator_fc(x, params, input_size=28 ** 2, tb=4096):
    """Flatten input (PyTorch x.view(-1, input_size)) and run the tiled kernel."""
    w1, b1, w2, b2, w3, b3 = params
    x2d = x.reshape(-1, input_size)
    B = x2d.shape[0]

    # Narrow-dtype streaming only if x is *stored* narrow.  Never cast x here:
    # an in-wrapper astype would read the f32 x and write a bf16 copy, i.e. MORE
    # total HBM traffic than streaming f32 directly.
    if x2d.dtype == jnp.bfloat16:
        w1 = w1.astype(jnp.bfloat16)     # ~100 KiB, keeps layer-1 MXU native bf16
    elif x2d.dtype != jnp.float32:
        x2d = x2d.astype(jnp.float32)    # correctness fallback for odd dtypes

    # --- batch-tile size ------------------------------------------------------
    tb = min(tb, B)
    # Keep >= 2 grid tiles for big batches so v7x's 2 TensorCores both get work
    # under dimension_semantics=("parallel",).
    if B >= 1024 and pl.cdiv(B, tb) < 2:
        tb = ((pl.cdiv(B, 2) + 7) // 8) * 8
    num_tiles = pl.cdiv(B, tb)

    itemsize = jnp.dtype(x2d.dtype).itemsize
    param_bytes = sum(int(p.size) * jnp.dtype(p.dtype).itemsize
                      for p in (w1, b1, w2, b2, w3, b3))
    # Double-buffered x stream dominates; weights/out counted conservatively 2x.
    vmem_need = 2 * tb * input_size * itemsize + 2 * param_bytes + 2 * tb * 4
    vmem_limit = int(max(32 << 20, vmem_need + (4 << 20)))

    h1, h2 = w1.shape[1], w2.shape[1]
    cost = pl.CostEstimate(
        flops=2 * B * (input_size * h1 + h1 * h2 + h2 * 1),
        transcendentals=B,                                        # one exp per row
        bytes_accessed=B * input_size * itemsize + B * 4 + param_bytes,
    )

    def resident(i):          # weights/biases: same block every step -> fetched once
        return (0, 0)

    out_rows = pl.pallas_call(
        disc_fc_kernel,
        out_shape=jax.ShapeDtypeStruct((num_tiles, 1, tb), jnp.float32),
        grid=(num_tiles,),
        in_specs=[
            pl.BlockSpec((tb, input_size), lambda i: (i, 0)),     # streamed x tile
            pl.BlockSpec(w1.shape, resident),
            pl.BlockSpec(b1.shape, resident),
            pl.BlockSpec(w2.shape, resident),
            pl.BlockSpec(b2.shape, resident),
            pl.BlockSpec(w3.shape, resident),
            pl.BlockSpec(b3.shape, resident),
        ],
        out_specs=pl.BlockSpec((1, 1, tb), lambda i: (i, 0, 0)),  # lane-dense row
        compiler_params=pltpu.CompilerParams(
            dimension_semantics=("parallel",),    # shards batch tiles on v7x's 2 TCs
            vmem_limit_bytes=vmem_limit,
        ),
        cost_estimate=cost,
    )(x2d, w1, b1, w2, b2, w3, b3)

    # Un-tile the lane-dense rows back to a (B, 1) column (output is tiny).
    return out_rows.reshape(-1)[:B].reshape(B, 1)


def init_params(key, input_size=28 ** 2, hidden_sizes=(64, 16)):
    """PyTorch-style uniform(-1/sqrt(fan_in), 1/sqrt(fan_in)) init.

    w1/w2 stored as (in_features, out_features); w3 stored as (1, 16)
    (PyTorch (out, in)) so the kernel's lane-dense layer 3 needs no transpose.
    """
    h1, h2 = hidden_sizes
    ks = jax.random.split(key, 6)

    def u(k, shape, fan_in):
        bound = 1.0 / (fan_in ** 0.5)
        return jax.random.uniform(k, shape, jnp.float32, -bound, bound)

    w1 = u(ks[0], (input_size, h1), input_size)
    b1 = u(ks[1], (1, h1), input_size)
    w2 = u(ks[2], (h1, h2), h1)
    b2 = u(ks[3], (1, h2), h1)
    w3 = u(ks[4], (1, h2), h2)            # (out, in) = (1, 16)
    b3 = u(ks[5], (1, 1), h2)
    return (w1, b1, w2, b2, w3, b3)


def reference_forward(x, params, input_size=28 ** 2):
    """Pure-JAX reference for correctness checking."""
    w1, b1, w2, b2, w3, b3 = params
    h = x.reshape(-1, input_size).astype(jnp.float32)
    h = h @ w1 + b1
    h = jnp.where(h > 0, h, 0.2 * h)
    h = h @ w2 + b2
    h = jnp.where(h > 0, h, 0.2 * h)
    h = h @ w3.T + b3
    return jax.nn.sigmoid(h)


if __name__ == "__main__":
    key = jax.random.PRNGKey(0)
    kx, kp = jax.random.split(key)
    params = init_params(kp)

    # Small MNIST-like input: NCHW (2, 1, 28, 28); forward flattens to (2, 784).
    x = jax.random.normal(kx, (2, 1, 28, 28), jnp.float32)

    # f32 path (strict check)
    out = discriminator_fc(x, params)
    jax.block_until_ready(out)
    ref = reference_forward(x, params)
    assert out.shape == (2, 1)
    assert jnp.allclose(out, ref, atol=1e-5, rtol=1e-5)

    # bf16-at-rest fast path: cast OUTSIDE the kernel wrapper so HBM genuinely
    # holds bf16 (the wrapper never casts x, see perf notes above).
    x_bf16 = jax.block_until_ready(x.astype(jnp.bfloat16))
    out_bf16 = discriminator_fc(x_bf16, params)
    jax.block_until_ready(out_bf16)
    assert out_bf16.shape == (2, 1)
    assert jnp.allclose(out_bf16, ref, atol=5e-2, rtol=5e-2)

    # Multi-tile grid path (B > TB, incl. a partial last tile) to exercise the
    # pipeline and the lane-dense output slice-back.
    x_big = jax.random.normal(kx, (40, 1, 28, 28), jnp.float32)
    out_big = discriminator_fc(x_big, params, tb=16)
    jax.block_until_ready(out_big)
    ref_big = reference_forward(x_big, params)
    assert out_big.shape == (40, 1)
    assert jnp.allclose(out_big, ref_big, atol=1e-5, rtol=1e-5)

    # TODO(synk): optional fp8 (v7x) / int8 (v5e/v6e) x storage path not implemented.
    print("KERNEL_OK")
</pallas_src>

<mosaic_0001>
module attributes {stable_mosaic.version = 11 : i64} {
  func.func @disc_fc_kernel(%arg0: i32, %arg1: memref<2x784xf32, #tpu.memory_space<vmem>>, %arg2: memref<784x64xf32, #tpu.memory_space<vmem>>, %arg3: memref<1x64xf32, #tpu.memory_space<vmem>>, %arg4: memref<64x16xf32, #tpu.memory_space<vmem>>, %arg5: memref<1x16xf32, #tpu.memory_space<vmem>>, %arg6: memref<1x16xf32, #tpu.memory_space<vmem>>, %arg7: memref<1x1xf32, #tpu.memory_space<vmem>>, %arg8: memref<1x1x2xf32, #tpu.memory_space<vmem>>) attributes {dimension_semantics = [#tpu.dimension_semantics<parallel>], iteration_bounds = array<i64: 1>, scalar_prefetch = 0 : i64, scratch_operands = 0 : i64, tpu.core_type = #tpu.core_type<tc>, window_params = [{transform_indices = @transform_0, window_bounds = array<i64: 2, 784>}, {pipeline_mode = #tpu.pipeline_mode<synchronous>, transform_indices = @transform_1, window_bounds = array<i64: 784, 64>}, {pipeline_mode = #tpu.pipeline_mode<synchronous>, transform_indices = @transform_2, window_bounds = array<i64: 1, 64>}, {pipeline_mode = #tpu.pipeline_mode<synchronous>, transform_indices = @transform_3, window_bounds = array<i64: 64, 16>}, {pipeline_mode = #tpu.pipeline_mode<synchronous>, transform_indices = @transform_4, window_bounds = array<i64: 1, 16>}, {pipeline_mode = #tpu.pipeline_mode<synchronous>, transform_indices = @transform_5, window_bounds = array<i64: 1, 16>}, {pipeline_mode = #tpu.pipeline_mode<synchronous>, transform_indices = @transform_6, window_bounds = array<i64: 1, 1>}, {transform_indices = @transform_7, window_bounds = array<i64: 1, 1, 2>}]} {
    %c0 = arith.constant 0 : index
    %c0_0 = arith.constant 0 : index
    %0 = vector.load %arg1[%c0, %c0_0] : memref<2x784xf32, #tpu.memory_space<vmem>>, vector<2x784xf32>
    %c0_1 = arith.constant 0 : index
    %c0_2 = arith.constant 0 : index
    %1 = vector.load %arg2[%c0_1, %c0_2] : memref<784x64xf32, #tpu.memory_space<vmem>>, vector<784x64xf32>
    %cst = arith.constant dense<0.000000e+00> : vector<2x64xf32>
    %2 = tpu.matmul %0, %1, %cst {dimension_numbers = #tpu.dot_dimension_numbers<[1], [0], [0], [1], [0, 0, 1, 1], [], []>} : vector<2x784xf32>, vector<784x64xf32>, vector<2x64xf32> -> vector<2x64xf32>
    %c0_3 = arith.constant 0 : index
    %c0_4 = arith.constant 0 : index
    %3 = vector.load %arg3[%c0_3, %c0_4] : memref<1x64xf32, #tpu.memory_space<vmem>>, vector<1x64xf32>
    %4 = vector.broadcast %3 : vector<1x64xf32> to vector<2x64xf32>
    %5 = arith.addf %2, %4 : vector<2x64xf32>
    %cst_5 = arith.constant 0.000000e+00 : f32
    %6 = vector.broadcast %cst_5 : f32 to vector<2x64xf32>
    %7 = arith.cmpf ogt, %5, %6 : vector<2x64xf32>
    %cst_6 = arith.constant 2.000000e-01 : f32
    %8 = vector.broadcast %cst_6 : f32 to vector<2x64xf32>
    %9 = arith.mulf %8, %5 : vector<2x64xf32>
    %10 = arith.select %7, %5, %9 : vector<2x64xi1>, vector<2x64xf32>
    %c0_7 = arith.constant 0 : index
    %c0_8 = arith.constant 0 : index
    %11 = vector.load %arg4[%c0_7, %c0_8] : memref<64x16xf32, #tpu.memory_space<vmem>>, vector<64x16xf32>
    %cst_9 = arith.constant dense<0.000000e+00> : vector<2x16xf32>
    %12 = tpu.matmul %10, %11, %cst_9 {dimension_numbers = #tpu.dot_dimension_numbers<[1], [0], [0], [1], [0, 0, 1, 1], [], []>} : vector<2x64xf32>, vector<64x16xf32>, vector<2x16xf32> -> vector<2x16xf32>
    %c0_10 = arith.constant 0 : index
    %c0_11 = arith.constant 0 : index
    %13 = vector.load %arg5[%c0_10, %c0_11] : memref<1x16xf32, #tpu.memory_space<vmem>>, vector<1x16xf32>
    %14 = vector.broadcast %13 : vector<1x16xf32> to vector<2x16xf32>
    %15 = arith.addf %12, %14 : vector<2x16xf32>
    %cst_12 = arith.constant 0.000000e+00 : f32
    %16 = vector.broadcast %cst_12 : f32 to vector<2x16xf32>
    %17 = arith.cmpf ogt, %15, %16 : vector<2x16xf32>
    %cst_13 = arith.constant 2.000000e-01 : f32
    %18 = vector.broadcast %cst_13 : f32 to vector<2x16xf32>
    %19 = arith.mulf %18, %15 : vector<2x16xf32>
    %20 = arith.select %17, %15, %19 : vector<2x16xi1>, vector<2x16xf32>
    %c0_14 = arith.constant 0 : index
    %c0_15 = arith.constant 0 : index
    %21 = vector.load %arg6[%c0_14, %c0_15] : memref<1x16xf32, #tpu.memory_space<vmem>>, vector<1x16xf32>
    %cst_16 = arith.constant dense<0.000000e+00> : vector<1x2xf32>
    %22 = tpu.matmul %21, %20, %cst_16 {dimension_numbers = #tpu.dot_dimension_numbers<[1], [1], [0], [0], [0, 0, 1, 0], [], []>} : vector<1x16xf32>, vector<2x16xf32>, vector<1x2xf32> -> vector<1x2xf32>
    %c0_17 = arith.constant 0 : index
    %c0_18 = arith.constant 0 : index
    %23 = vector.load %arg7[%c0_17, %c0_18] : memref<1x1xf32, #tpu.memory_space<vmem>>, vector<1x1xf32>
    %24 = vector.broadcast %23 : vector<1x1xf32> to vector<1x2xf32>
    %25 = arith.addf %22, %24 : vector<1x2xf32>
    %26 = math.absf %25 : vector<1x2xf32>
    %cst_19 = arith.constant 0.000000e+00 : f32
    %27 = vector.broadcast %cst_19 : f32 to vector<1x2xf32>
    %28 = arith.subf %27, %26 : vector<1x2xf32>
    %29 = math.exp %28 : vector<1x2xf32>
    %cst_20 = arith.constant 0.000000e+00 : f32
    %30 = vector.broadcast %cst_20 : f32 to vector<1x2xf32>
    %31 = arith.cmpf oge, %25, %30 : vector<1x2xf32>
    %cst_21 = arith.constant 1.000000e+00 : f32
    %32 = vector.broadcast %cst_21 : f32 to vector<1x2xf32>
    %33 = arith.addf %32, %29 : vector<1x2xf32>
    %cst_22 = arith.constant 1.000000e+00 : f32
    %34 = vector.broadcast %cst_22 : f32 to vector<1x2xf32>
    %35 = arith.divf %34, %33 : vector<1x2xf32>
    %cst_23 = arith.constant 1.000000e+00 : f32
    %36 = vector.broadcast %cst_23 : f32 to vector<1x2xf32>
    %37 = arith.addf %36, %29 : vector<1x2xf32>
    %38 = arith.divf %29, %37 : vector<1x2xf32>
    %39 = arith.select %31, %35, %38 : vector<1x2xi1>, vector<1x2xf32>
    %c0_24 = arith.constant 0 : index
    %c0_25 = arith.constant 0 : index
    %c0_26 = arith.constant 0 : index
    %40 = vector.load %arg8[%c0_24, %c0_25, %c0_26] : memref<1x1x2xf32, #tpu.memory_space<vmem>>, vector<1x1x2xf32>
    %41 = vector.shape_cast %40 : vector<1x1x2xf32> to vector<1x2xf32>
    %42 = vector.shape_cast %39 : vector<1x2xf32> to vector<1x1x2xf32>
    tpu.vector_store %arg8[%c0_24, %c0_25, %c0_26], %42 {strides = array<i32>} : memref<1x1x2xf32, #tpu.memory_space<vmem>>, vector<1x1x2xf32>,
    return
  }
  func.func @transform_0(%arg0: i32) -> (i32, i32) {
    %c0_i32 = arith.constant 0 : i32
    %c0_i32_0 = arith.constant 0 : i32
    return %arg0, %c0_i32 : i32, i32
  }
  func.func @transform_1(%arg0: i32) -> (i32, i32) {
    %c0_i32 = arith.constant 0 : i32
    %c0_i32_0 = arith.constant 0 : i32
    %c0_i32_1 = arith.constant 0 : i32
    return %c0_i32, %c0_i32_0 : i32, i32
  }
  func.func @transform_2(%arg0: i32) -> (i32, i32) {
    %c0_i32 = arith.constant 0 : i32
    %c0_i32_0 = arith.constant 0 : i32
    %c0_i32_1 = arith.constant 0 : i32
    return %c0_i32, %c0_i32_0 : i32, i32
  }
  func.func @transform_3(%arg0: i32) -> (i32, i32) {
    %c0_i32 = arith.constant 0 : i32
    %c0_i32_0 = arith.constant 0 : i32
    %c0_i32_1 = arith.constant 0 : i32
    return %c0_i32, %c0_i32_0 : i32, i32
  }
  func.func @transform_4(%arg0: i32) -> (i32, i32) {
    %c0_i32 = arith.constant 0 : i32
    %c0_i32_0 = arith.constant 0 : i32
    %c0_i32_1 = arith.constant 0 : i32
    return %c0_i32, %c0_i32_0 : i32, i32
  }
  func.func @transform_5(%arg0: i32) -> (i32, i32) {
    %c0_i32 = arith.constant 0 : i32
    %c0_i32_0 = arith.constant 0 : i32
    %c0_i32_1 = arith.constant 0 : i32
    return %c0_i32, %c0_i32_0 : i32, i32
  }
  func.func @transform_6(%arg0: i32) -> (i32, i32) {
    %c0_i32 = arith.constant 0 : i32
    %c0_i32_0 = arith.constant 0 : i32
    %c0_i32_1 = arith.constant 0 : i32
    return %c0_i32, %c0_i32_0 : i32, i32
  }
  func.func @transform_7(%arg0: i32) -> (i32, i32, i32) {
    %c0_i32 = arith.constant 0 : i32
    %c0_i32_0 = arith.constant 0 : i32
    %c0_i32_1 = arith.constant 0 : i32
    return %arg0, %c0_i32, %c0_i32_0 : i32, i32, i32
  }
}

</mosaic_0001>

<bundles_post_ra>
// kernel: discriminator_fc.1
= control target key start
LH: loop header
LB: loop body
LE: loop exit
PB: predicated region body
PF: predicated region fallthrough
CT: control target
= control target key end

     0   :  { %s1396_s0 = inlined_call_operand.vmem [shape: f32[2,784], index: 0, kind: input, shape index: {}]   ;;  %s1397_s1 = inlined_call_operand.vmem [shape: f32[784,64], index: 1, kind: input, shape index: {}]   ;;  %s1398_s2 = inlined_call_operand.vmem [shape: f32[1,64], index: 2, kind: input, shape index: {}]   ;;  %s1399_s3 = inlined_call_operand.vmem [shape: f32[64,16], index: 3, kind: input, shape index: {}]   ;;  %s1400_s4 = inlined_call_operand.vmem [shape: f32[1,16], index: 4, kind: input, shape index: {}]   ;;  %s1401_s5 = inlined_call_operand.vmem [shape: f32[1,16], index: 5, kind: input, shape index: {}]   ;;  %s1402_s6 = inlined_call_operand.<no memory space> [shape: f32[1,1], index: 6, kind: input, shape index: {}]   ;;  %s1403_s7 = inlined_call_operand.hbm [shape: f32[1,1,2], index: 7, kind: output, shape index: {}]  }
   0x1   :  { %v12_v0 = vstv %s1402_s6 }
   0x2   :  { %13 = vst [vmem:[#allocation2] sm:$0x1] %v12_v0 }
   0x3   :  { %v47_v1 = vld [vmem:[%s1397_s1 + $0x80] sm:$0xff]  ;;  %v48_v2 = vld [vmem:[%s1397_s1 + $0x88] sm:$0xff]  ;;  %v49_v12 = vld [vmem:[%s1397_s1 + $0x90] sm:$0xff]  ;;  %v972_v44 = vmov 1983009808   ;;  %v142_v46 = vlaneseq }
   0x4   :  { %v31_v3 = vld [vmem:[%s1397_s1] sm:$0xff]  ;;  %v824_v4 = vpack.c.bf16 %v48_v2, %v47_v1  ;;  %v32_v5 = vld [vmem:[%s1397_s1 + $0x8] sm:$0xff]  ;;  %v50_v14 = vld [vmem:[%s1397_s1 + $0x98] sm:$0xff]  ;;  %v140_v45 = vunpack.c.l.s4 %v972_v44 }
   0x5   :  { %v79_v6 = vld [vmem:[%s1397_s1 + $0x180] sm:$0xff]  ;;  %v80_v7 = vld [vmem:[%s1397_s1 + $0x188] sm:$0xff]  ;;  %v826_v8 = vpack.c.bf16 %v32_v5, %v31_v3  ;;  %v33_v15 = vld [vmem:[%s1397_s1 + $0x10] sm:$0xff]  ;;  %v828_v17 = vpack.c.bf16 %v50_v14, %v49_v12  ;;  %v1138_v61 = vshrl.u32 %v142_v46, 7 }
   0x6   :  { %v856_v9 = vpack.c.bf16 %v80_v7, %v79_v6  ;;  %v63_v10 = vld [vmem:[%s1397_s1 + $0x100] sm:$0xff]  ;;  %v64_v11 = vld [vmem:[%s1397_s1 + $0x108] sm:$0xff]  ;;  %825 = vmatprep.subr.bf16.mxu0 %v824_v4  ;;  %v34_v16 = vld [vmem:[%s1397_s1 + $0x18] sm:$0xff]  ;;  %v141_v60 = vunpack.c.0.s8 %v140_v45 }
   0x7   :  { %v858_v13 = vpack.c.bf16 %v64_v11, %v63_v10  ;;  %827 = vmatpush3.bf16.msra.mxu0 %v826_v8  ;;  %v830_v18 = vpack.c.bf16 %v34_v16, %v33_v15  ;;  %v81_v19 = vld [vmem:[%s1397_s1 + $0x190] sm:$0xff]  ;;  %v82_v20 = vld [vmem:[%s1397_s1 + $0x198] sm:$0xff]  ;;  %v51_v24 = vld [vmem:[%s1397_s1 + $0xa0] sm:$0xff] }
   0x8   :  { %857 = vmatprep.subr.bf16.mxu1 %v856_v9  ;;  %v65_v21 = vld [vmem:[%s1397_s1 + $0x110] sm:$0xff]  ;;  %v860_v22 = vpack.c.bf16 %v82_v20, %v81_v19  ;;  %v66_v23 = vld [vmem:[%s1397_s1 + $0x118] sm:$0xff]  ;;  %v52_v25 = vld [vmem:[%s1397_s1 + $0xa8] sm:$0xff]  ;;  %829 = vmatprep.subr.bf16.mxu0 %v828_v17  ;;  %v1168_v11 = vsub.s32 %v141_v60, %v1138_v61 }
   0x9   :  { %859 = vmatpush3.bf16.msra.mxu1 %v858_v13  ;;  %v862_v26 = vpack.c.bf16 %v66_v23, %v65_v21  ;;  %v832_v27 = vpack.c.bf16 %v52_v25, %v51_v24  ;;  %v35_v28 = vld [vmem:[%s1397_s1 + $0x20] sm:$0xff]  ;;  %v36_v29 = vld [vmem:[%s1397_s1 + $0x28] sm:$0xff]  ;;  %v53_v36 = vld [vmem:[%s1397_s1 + $0xb0] sm:$0xff] }
   0xa   :  { %v83_v30 = vld [vmem:[%s1397_s1 + $0x1a0] sm:$0xff]  ;;  %861 = vmatprep.subr.bf16.mxu1 %v860_v22  ;;  %v84_v31 = vld [vmem:[%s1397_s1 + $0x1a8] sm:$0xff]  ;;  %v834_v34 = vpack.c.bf16 %v36_v29, %v35_v28  ;;  %v54_v37 = vld [vmem:[%s1397_s1 + $0xb8] sm:$0xff] }
   0xb   :  { %v67_v32 = vld [vmem:[%s1397_s1 + $0x120] sm:$0xff]  ;;  %v68_v33 = vld [vmem:[%s1397_s1 + $0x128] sm:$0xff]  ;;  %831 = vmatpush3.bf16.msra.mxu0 %v830_v18  ;;  %v864_v35 = vpack.c.bf16 %v84_v31, %v83_v30  ;;  %v37_v38 = vld [vmem:[%s1397_s1 + $0x30] sm:$0xff]  ;;  %v836_v40 = vpack.c.bf16 %v54_v37, %v53_v36 }
   0xc   :  { %833 = vmatprep.subr.bf16.mxu0 %v832_v27  ;;  %v866_v39 = vpack.c.bf16 %v68_v33, %v67_v32  ;;  %v38_v41 = vld [vmem:[%s1397_s1 + $0x38] sm:$0xff]  ;;  %v85_v42 = vld [vmem:[%s1397_s1 + $0x1b0] sm:$0xff]  ;;  %v55_v50 = vld [vmem:[%s1397_s1 + $0xc0] sm:$0xff] }
   0xd   :  { %863 = vmatpush3.bf16.msra.mxu1 %v862_v26  ;;  %v86_v43 = vld [vmem:[%s1397_s1 + $0x1b8] sm:$0xff]  ;;  %v69_v48 = vld [vmem:[%s1397_s1 + $0x130] sm:$0xff]  ;;  %v56_v51 = vld [vmem:[%s1397_s1 + $0xc8] sm:$0xff]  ;;  %v838_v52 = vpack.c.bf16 %v38_v41, %v37_v38 }
   0xe   :  { %865 = vmatprep.subr.bf16.mxu1 %v864_v35  ;;  %v868_v47 = vpack.c.bf16 %v86_v43, %v85_v42  ;;  %v70_v49 = vld [vmem:[%s1397_s1 + $0x138] sm:$0xff]  ;;  %v87_v53 = vld [vmem:[%s1397_s1 + $0x1c0] sm:$0xff]  ;;  %v88_v54 = vld [vmem:[%s1397_s1 + $0x1c8] sm:$0xff]  ;;  %v840_v56 = vpack.c.bf16 %v56_v51, %v55_v50 }
   0xf   :  { %835 = vmatpush3.bf16.msra.mxu0 %v834_v34  ;;  %v870_v55 = vpack.c.bf16 %v70_v49, %v69_v48  ;;  %v39_v57 = vld [vmem:[%s1397_s1 + $0x40] sm:$0xff]  ;;  %v40_v58 = vld [vmem:[%s1397_s1 + $0x48] sm:$0xff]  ;;  %v872_v62 = vpack.c.bf16 %v88_v54, %v87_v53  ;;  %v57_v0 = vld [vmem:[%s1397_s1 + $0xd0] sm:$0xff] }
  0x10   :  { %837 = vmatprep.subr.bf16.mxu0 %v836_v40  ;;  %v71_v59 = vld [vmem:[%s1397_s1 + $0x140] sm:$0xff]  ;;  %v72_v63 = vld [vmem:[%s1397_s1 + $0x148] sm:$0xff]  ;;  %v58_v1 = vld [vmem:[%s1397_s1 + $0xd8] sm:$0xff]  ;;  %v842_v4 = vpack.c.bf16 %v40_v58, %v39_v57 }
  0x11   :  { %867 = vmatpush3.bf16.msra.mxu1 %v866_v39  ;;  %v89_v2 = vld [vmem:[%s1397_s1 + $0x1d0] sm:$0xff]  ;;  %v90_v3 = vld [vmem:[%s1397_s1 + $0x1d8] sm:$0xff]  ;;  %v874_v6 = vpack.c.bf16 %v72_v63, %v71_v59  ;;  %v844_v7 = vpack.c.bf16 %v58_v1, %v57_v0  ;;  %v59_v13 = vld [vmem:[%s1397_s1 + $0xe0] sm:$0xff] }
  0x12   :  { %869 = vmatprep.subr.bf16.mxu1 %v868_v47  ;;  %v41_v5 = vld [vmem:[%s1397_s1 + $0x50] sm:$0xff]  ;;  %v42_v8 = vld [vmem:[%s1397_s1 + $0x58] sm:$0xff]  ;;  %v876_v12 = vpack.c.bf16 %v90_v3, %v89_v2  ;;  %v60_v14 = vld [vmem:[%s1397_s1 + $0xe8] sm:$0xff] }
  0x13   :  { %839 = vmatpush3.bf16.msra.mxu0 %v838_v52  ;;  %v73_v9 = vld [vmem:[%s1397_s1 + $0x150] sm:$0xff]  ;;  %v74_v10 = vld [vmem:[%s1397_s1 + $0x158] sm:$0xff]  ;;  %v91_v15 = vld [vmem:[%s1397_s1 + $0x1e0] sm:$0xff]  ;;  %v846_v17 = vpack.c.bf16 %v42_v8, %v41_v5  ;;  %v848_v20 = vpack.c.bf16 %v60_v14, %v59_v13 }
  0x14   :  { %841 = vmatprep.subr.bf16.mxu0 %v840_v56  ;;  %v92_v16 = vld [vmem:[%s1397_s1 + $0x1e8] sm:$0xff]  ;;  %v878_v18 = vpack.c.bf16 %v74_v10, %v73_v9  ;;  %v29_v19 = vld [vmem:[%s1396_s0] sm:$0xff]  ;;  %v61_v28 = vld [vmem:[%s1397_s1 + $0xf0] sm:$0xff] }
  0x15   :  { %871 = vmatpush3.bf16.msra.mxu1 %v870_v55  ;;  %v43_v21 = vld [vmem:[%s1397_s1 + $0x60] sm:$0xff]  ;;  %v44_v22 = vld [vmem:[%s1397_s1 + $0x68] sm:$0xff]  ;;  %v145_v24 = vrot.slane %v29_v19, %v1168_v11  ;;  %v138_v25 = vcombine.high %v29_v19, %v29_v19  ;;  %v880_v26 = vpack.c.bf16 %v92_v16, %v91_v15  ;;  %v62_v29 = vld [vmem:[%s1397_s1 + $0xf8] sm:$0xff] }
  0x16   :  { %873 = vmatprep.subr.bf16.mxu1 %v872_v62  ;;  %v75_v23 = vld [vmem:[%s1397_s1 + $0x160] sm:$0xff]  ;;  %v76_v27 = vld [vmem:[%s1397_s1 + $0x168] sm:$0xff]  ;;  %v93_v30 = vld [vmem:[%s1397_s1 + $0x1f0] sm:$0xff]  ;;  %v850_v34 = vpack.c.bf16 %v44_v22, %v43_v21  ;;  %v852_v36 = vpack.c.bf16 %v62_v29, %v61_v28 }
  0x17   :  { %843 = vmatpush3.bf16.msra.mxu0 %v842_v4  ;;  %v94_v31 = vld [vmem:[%s1397_s1 + $0x1f8] sm:$0xff]  ;;  %v153_v32 = vcombine.high %v145_v24, %v145_v24  ;;  %v152_v33 = vrot.slane %v138_v25, %v1168_v11  ;;  %v882_v35 = vpack.c.bf16 %v76_v27, %v75_v23  ;;  %v45_v37 = vld [vmem:[%s1397_s1 + $0x70] sm:$0xff]  ;;  %v111_v43 = vld [vmem:[%s1397_s1 + $0x280] sm:$0xff] }
  0x18   :  { %845 = vmatprep.subr.bf16.mxu0 %v844_v7  ;;  %v46_v38 = vld [vmem:[%s1397_s1 + $0x78] sm:$0xff]  ;;  %v77_v39 = vld [vmem:[%s1397_s1 + $0x170] sm:$0xff]  ;;  %v884_v41 = vpack.c.bf16 %v94_v31, %v93_v30  ;;  %v112_v44 = vld [vmem:[%s1397_s1 + $0x288] sm:$0xff] }
  0x19   :  { %875 = vmatpush3.bf16.msra.mxu1 %v874_v6  ;;  %v154_v40 = vcombine.high %v152_v33, %v152_v33  ;;  %244 = vmatprep.mubr.f32.mxu0 %v153_v32  ;;  %v78_v42 = vld [vmem:[%s1397_s1 + $0x178] sm:$0xff]  ;;  %v854_v45 = vpack.c.bf16 %v46_v38, %v45_v37  ;;  %v888_v47 = vpack.c.bf16 %v112_v44, %v111_v43  ;;  %v95_v48 = vld [vmem:[%s1397_s1 + $0x200] sm:$0xff]  ;;  %v96_v49 = vld [vmem:[%s1397_s1 + $0x208] sm:$0xff] }
  0x1a   :  { %877 = vmatprep.subr.bf16.mxu1 %v876_v12  ;;  %v886_v46 = vpack.c.bf16 %v78_v42, %v77_v39  ;;  %v113_v50 = vld [vmem:[%s1397_s1 + $0x290] sm:$0xff]  ;;  %v114_v51 = vld [vmem:[%s1397_s1 + $0x298] sm:$0xff]  ;;  %v890_v52 = vpack.c.bf16 %v96_v49, %v95_v48  ;;  %v30_v54 = vld [vmem:[%s1396_s0 + $0x8] sm:$0x3f] }
  0x1b   :  { %847 = vmatpush3.bf16.msra.mxu0 %v846_v17  ;;  %314 = vmatprep.mubr.f32.mxu1 %v154_v40  ;;  %v97_v53 = vld [vmem:[%s1397_s1 + $0x210] sm:$0xff]  ;;  %v127_v55 = vld [vmem:[%s1397_s1 + $0x300] sm:$0xff]  ;;  %v892_v56 = vpack.c.bf16 %v114_v51, %v113_v50  ;;  %v98_v57 = vld [vmem:[%s1397_s1 + $0x218] sm:$0xff]  ;;  %v155_v58 = vcombine.high %v30_v54, %v30_v54  ;;  %v1254_v59 = vrot.slane %v30_v54, %v1168_v11 }
  0x1c   :  { %849 = vmatprep.subr.bf16.mxu0 %v848_v20  ;;  %v128_v60 = vld [vmem:[%s1397_s1 + $0x308] sm:$0xff] }
  0x1d   :  { %879 = vmatpush3.bf16.msra.mxu1 %v878_v18 }
  0x1e   :  { %881 = vmatprep.subr.bf16.mxu1 %v880_v26 }
  0x1f   :  { %851 = vmatpush3.bf16.msra.mxu0 %v850_v34 }
  0x20   :  { %853 = vmatprep.subr.bf16.mxu0 %v852_v36 }
  0x21   :  { %883 = vmatpush3.bf16.msra.mxu1 %v882_v35 }
  0x22   :  { %885 = vmatprep.subr.bf16.mxu1 %v884_v41 }
  0x23   :  { %855 = vmatpush3.bf16.msra.mxu0 %v854_v45 }
  0x24   :  { %889 = vmatprep.subr.bf16.mxu0 %v888_v47 }
  0x25   :  { %887 = vmatpush3.bf16.msra.mxu1 %v886_v46 }
  0x26   :  { %14 = vsyncpa [#allocation4], 0  ;;  %v115_v62 = vld [vmem:[%s1397_s1 + $0x2a0] sm:$0xff]  ;;  %v116_v63 = vld [vmem:[%s1397_s1 + $0x2a8] sm:$0xff]  ;;  %v973_v0 = vmov 0.0|0.0   ;;  %v921_v1 = vpack.c.bf16 %v128_v60, %v127_v55  ;;  %245 = vmatmul.mubr.f32.vlgmr.msra.gmra.mrb[0].mxu0 %v145_v24  ;;  %v170_v2 = vcombine.high %v1254_v59, %v1254_v59  ;;  %v894_v3 = vpack.c.bf16 %v98_v57, %v97_v53 }
  0x27   :  { %920 = vmatprep.subr.bf16.mxu1 %v973_v0  ;;  %891 = vmatpush3.bf16.msra.mxu0 %v890_v52  ;;  %v896_v4 = vpack.c.bf16 %v116_v63, %v115_v62  ;;  %v99_v5 = vld [vmem:[%s1397_s1 + $0x220] sm:$0xff]  ;;  %v100_v6 = vld [vmem:[%s1397_s1 + $0x228] sm:$0xff]  ;;  %v169_v7 = vrot.slane %v155_v58, %v1168_v11  ;;  %v117_v8 = vld [vmem:[%s1397_s1 + $0x2b0] sm:$0xff]  ;;  %vm974_vm0 = vmmov 0   ;;  %v975_v10 = vmov 0.0  }
  0x28   :  { %315 = vmatmul.mubr.f32.vlgmr.msra.gmra.mrb[0].mxu1 %v152_v33  ;;  %893 = vmatprep.subr.bf16.mxu0 %v892_v56  ;;  %v118_v9 = vld [vmem:[%s1397_s1 + $0x2b8] sm:$0xff]  ;;  %vm177_vm1 = vcmask 130048   ;;  %v898_v11 = vpack.c.bf16 %v100_v6, %v99_v5  ;;  %v101_v13 = vld [vmem:[%s1397_s1 + $0x230] sm:$0xff]  ;;  %v119_v15 = vld [vmem:[%s1397_s1 + $0x2c0] sm:$0xff]  ;;  %vm478_vm3 = vcmask 523264   ;;  %vm652_vm5 = vcmask 8192  }
  0x29   :  { %384 = vmatprep.mubr.f32.mxu0 %v170_v2  ;;  %922 = vmatpush3.bf16.msra.mxu1 %v921_v1  ;;  %v900_v12 = vpack.c.bf16 %v118_v9, %v117_v8  ;;  %v102_v14 = vld [vmem:[%s1397_s1 + $0x238] sm:$0xff]  ;;  %v120_v16 = vld [vmem:[%s1397_s1 + $0x2c8] sm:$0xff]  ;;  %v103_v19 = vld [vmem:[%s1397_s1 + $0x240] sm:$0xff]  ;;  %v976_v8 = vmov 0  }
  0x2a   :  { %797 = vmatprep.mubr.msk.f32.mxu1 %vm974_vm0, %v975_v10  ;;  %923 = vmatprep.subr.bf16.mxu1 %v973_v0  ;;  %v902_v17 = vpack.c.bf16 %v102_v14, %v101_v13  ;;  %v904_v18 = vpack.c.bf16 %v120_v16, %v119_v15  ;;  %v104_v20 = vld [vmem:[%s1397_s1 + $0x248] sm:$0xff]  ;;  %v121_v21 = vld [vmem:[%s1397_s1 + $0x2d0] sm:$0xff]  ;;  %v122_v22 = vld [vmem:[%s1397_s1 + $0x2d8] sm:$0xff]  ;;  %v564_v16 = vsub.s32 0, %v1138_v61 }
  0x2b   :  { %895 = vmatpush3.bf16.msra.mxu0 %v894_v3  ;;  %v906_v23 = vpack.c.bf16 %v104_v20, %v103_v19  ;;  %v908_v24 = vpack.c.bf16 %v122_v22, %v121_v21  ;;  %v105_v25 = vld [vmem:[%s1397_s1 + $0x250] sm:$0xff]  ;;  %v106_v26 = vld [vmem:[%s1397_s1 + $0x258] sm:$0xff]  ;;  %v123_v27 = vld [vmem:[%s1397_s1 + $0x2e0] sm:$0xff]  ;;  %941 = vset.pattern.permute.xlu0 %v976_v8 }
  0x2c   :  { %897 = vmatprep.subr.bf16.mxu0 %v896_v4  ;;  %798 = vmatmul.mubr.msk.f32.vlgmr.msra.gmra.mrb[2].mxu1 %vm177_vm1, %v169_v7  ;;  %v124_v28 = vld [vmem:[%s1397_s1 + $0x2e8] sm:$0xff]  ;;  %v910_v29 = vpack.c.bf16 %v106_v26, %v105_v25  ;;  %v107_v31 = vld [vmem:[%s1397_s1 + $0x260] sm:$0xff]  ;;  %v125_v33 = vld [vmem:[%s1397_s1 + $0x2f0] sm:$0xff] }
  0x2d   :  { %816 = vmatprep.mubr.msk.f32.mxu1 %vm974_vm0, %v975_v10  ;;  %v912_v30 = vpack.c.bf16 %v124_v28, %v123_v27  ;;  %v108_v32 = vld [vmem:[%s1397_s1 + $0x268] sm:$0xff]  ;;  %v126_v34 = vld [vmem:[%s1397_s1 + $0x2f8] sm:$0xff]  ;;  %v109_v37 = vld [vmem:[%s1397_s1 + $0x270] sm:$0xff] }
  0x2e   :  { %v914_v35 = vpack.c.bf16 %v108_v32, %v107_v31  ;;  %v916_v36 = vpack.c.bf16 %v126_v34, %v125_v33  ;;  %v110_v38 = vld [vmem:[%s1397_s1 + $0x278] sm:$0xff]  ;;  %v463_v40 = vld [vmem:[%s1399_s3] sm:$0xff]  ;;  %v464_v41 = vld [vmem:[%s1399_s3 + $0x8] sm:$0xff] }
  0x2f   :  { %899 = vmatpush3.bf16.msra.mxu0 %v898_v11  ;;  %v918_v39 = vpack.c.bf16 %v110_v38, %v109_v37  ;;  %v924_v42 = vpack.c.bf16 %v464_v41, %v463_v40  ;;  %v465_v43 = vld [vmem:[%s1399_s3 + $0x10] sm:$0xff]  ;;  %v466_v44 = vld [vmem:[%s1399_s3 + $0x18] sm:$0xff]  ;;  %v467_v46 = vld [vmem:[%s1399_s3 + $0x20] sm:$0xff] }
  0x30   :  { %901 = vmatprep.subr.bf16.mxu0 %v900_v12  ;;  %v927_v45 = vpack.c.bf16 %v466_v44, %v465_v43  ;;  %v468_v47 = vld [vmem:[%s1399_s3 + $0x28] sm:$0xff]  ;;  %v469_v49 = vld [vmem:[%s1399_s3 + $0x30] sm:$0xff]  ;;  %v470_v50 = vld [vmem:[%s1399_s3 + $0x38] sm:$0xff] }
  0x31   :  { %925 = vmatpush3.bf16.msra.mxu1 %v924_v42  ;;  %v930_v48 = vpack.c.bf16 %v468_v47, %v467_v46  ;;  %v933_v51 = vpack.c.bf16 %v470_v50, %v469_v49  ;;  %v668_v53 = vld [vmem:[%s1398_s2] ss:$0 sm:$0xff] }
  0x32   :  { %926 = vmatprep.subr.bf16.mxu1 %v973_v0  ;;  %v556_v7 = vld [vmem:[#allocation2] sm:$0x1] }
  0x33   :  { %903 = vmatpush3.bf16.msra.mxu0 %v902_v17  ;;  %559 = vperm.xlu0 %941, %v556_v7   ;;  %v670_v9 = vld [vmem:[%s1400_s4] ss:$0 sm:$0xff]  ;;  %s977_s4 = smov [#allocation3]  }
  0x34   :  { %905 = vmatprep.subr.bf16.mxu0 %v904_v18  ;;  %s660_s26 = sshll.u32 %s977_s4, 4  ;;  %s661_s26 = int_to_ptr.vmem [resolvable:$true] %s660_s26 }
  0x35   :  { %928 = vmatpush3.bf16.msra.mxu1 %v927_v45  ;;  %s952_s27 = scalar_lea.vmem %s661_s26, 32  ;;  %p953_p1 = scmp.lt.s32.totalorder %s661_s26, %s661_s26 }
  0x36   :  { %929 = vmatprep.subr.bf16.mxu1 %v973_v0 }
  0x37   :  { %907 = vmatpush3.bf16.msra.mxu0 %v906_v23 }
  0x38   :  { %909 = vmatprep.subr.bf16.mxu0 %v908_v24 }
  0x39   :  { %931 = vmatpush3.bf16.msra.mxu1 %v930_v48 }
  0x3a   :  { %932 = vmatprep.subr.bf16.mxu1 %v973_v0 }
  0x3b   :  { %911 = vmatpush3.bf16.msra.mxu0 %v910_v29 }
  0x3c   :  { %913 = vmatprep.subr.bf16.mxu0 %v912_v30 }
  0x3d   :  { %934 = vmatpush3.bf16.msra.mxu1 %v933_v51 }
  0x3e   :  { %819 = vmatprep.subr.mxu1 %v975_v10 }
  0x3f   :  { %915 = vmatpush3.bf16.msra.mxu0 %v914_v35 }
  0x40   :  { %917 = vmatprep.subr.bf16.mxu0 %v916_v36 }
  0x43   :  { %919 = vmatpush3.bf16.msra.mxu0 %v918_v39 }
  0x46   :  { %385 = vmatmul.mubr.f32.vlgmr.msra.gmra.mrb[2].mxu0 %v1254_v59 }
  0xb2   :  { %v560_v17 = vpop.permute.xlu0 %559 }
  0xb3   :  { %v565_v18 = vrot.slane %v560_v17, %v564_v16 }
  0xf9   :  { %v706_v52 = vpop.f32.mrb[0].mxu0 }
  0xfa   :  { %v707_v54 = vpop.f32.mrb[1].mxu0 }
  0xfb   :  { %v741_v55 = vpop.f32.mrb[0].mxu1  ;;  %v708_v56 = vadd.f32 %v707_v54, %v706_v52 }
  0xfc   :  { %v742_v57 = vpop.f32.mrb[1].mxu1 }
  0xfd   :  { %v743_v58 = vadd.f32 %v742_v57, %v741_v55  ;;  %v247_v59 = vadd.f32 %v708_v56, %v668_v53 }
  0xff   :  { %v317_v60 = vadd.f32 %v743_v58, %v247_v59  ;;  %v456_v62 = vpop.f32.mrb[2].mxu1 }
 0x100   :  { %v799_v63 = vpop.f32.mrb[3].mxu1 }
 0x119   :  { %v776_v0 = vpop.f32.mrb[2].mxu0 }
 0x11a   :  { %v777_v1 = vpop.f32.mrb[3].mxu0 }
 0x11b   :  { %v778_v2 = vadd.f32 %v777_v1, %v776_v0 }
 0x11d   :  { %v387_v3 = vadd.f32 %v778_v2, %v317_v60 }
 0x11f   :  { %v457_v4 = vadd.f32 %v456_v62, %v387_v3 }
 0x121   :  { %vm460_vm2 = vcmp.gt.f32.partialorder %v457_v4, 0.0  ;;  %v461_v5 = vmul.f32 0.2, %v457_v4 }
 0x123   :  { %v462_v6 = vsel %vm460_vm2, %v457_v4, %v461_v5 }
 0x124   :  { %817 = vmatmul.mubr.msk.f32.vlgmr.msra.gmra.mrb[4].mxu1 %vm478_vm3, %v462_v6 }
 0x125   :  { %821 = vmatprep.mubr.msk.f32.mxu1 %vm974_vm0, %v975_v10  ;;  %v555_v10 = vld [vmem:[%s1401_s5] sm:$0x1]  ;;  %s948_s5 = scalar_lea.vmem %s661_s26, 16 }
 0x126   :  { %p949_p0 = scmp.ne.s32.totalorder %s661_s26, %s948_s5  ;;  %p954_p2 = scmp.lt.s32.totalorder %s952_s27, %s948_s5 }
 0x128   :  { %p955_p3 = por %p954_p2, %p953_p1 }
 0x12a   :  { %p956_p4 = pnand %p955_p3, %p949_p0 }
 0x1f7   :  { %v548_v11 = vpop.f32.mrb[4].mxu1 }
 0x1f8   :  { %v549_v12 = vadd.f32 %v670_v9, %v548_v11  ;;  %v818_v13 = vpop.f32.mrb[5].mxu1 }
 0x1fa   :  { %vm552_vm4 = vcmp.gt.f32.partialorder %v549_v12, 0.0  ;;  %v553_v14 = vmul.f32 0.2, %v549_v12 }
 0x1fc   :  { %v554_v15 = vsel %vm552_vm4, %v549_v12, %v553_v14 }
 0x1fd   :  { %820 = vmatpush3.xpose.msk.msra.mxu1 %vm177_vm1, %v554_v15 }
 0x200   :  { %822 = vmatmul.mubr.msk.f32.vlgmr.msra.gmra.mrb[6].mxu1 %vm177_vm1, %v555_v10 }
 0x2d3   :  { %v638_v19 = vpop.f32.mrb[6].mxu1 }
 0x2d4   :  { %v639_v20 = vadd.f32 %v638_v19, %v565_v18  ;;  %v823_v21 = vpop.f32.mrb[7].mxu1 }
 0x2d6   :  { %v642_v22 = vand.u32 2147483647, %v639_v20  ;;  %vm646_vm6 = vcmp.ge.f32.partialorder %v639_v20, 0.0 }
 0x2d8   :  { %v643_v23 = vsub.f32 0.0, %v642_v22 }
 0x2da   :  { %v644_v24 = vmul.f32 1.442695, %v643_v23 }
 0x2dc   :  { %944 = vpow2.f32 %v644_v24 }
 0x2e6   :  { %v945_v25 = vpop.eup %944 }
 0x2e7   :  { %v647_v26 = vadd.f32 1.0, %v945_v25 }
 0x2e9   :  { %946 = vrcp.f32 %v647_v26 }
 0x2f3   :  { %v947_v27 = vpop.eup %946 }
 0x2f4   :  { %v650_v28 = vmul.f32 %v947_v27, %v945_v25 }
 0x2f6   :  { %v651_v61 = vsel %vm646_vm6, %v947_v27, %v650_v28 }
 0x2f7   :  { %653 = vst.msk [vmem:[#allocation3] sm:$0x1] %vm652_vm5, %v651_v61 }
 0x2f8   :  { %959 = shalt.err (!%p956_p4)
}
 0x2f9   :  { %s960_s30 = scalar_lea.hbm %s1403_s7, 16 }
 0x2fa   :  { %p961_p5 = scmp.ne.s32.totalorder %s1403_s7, %s960_s30  ;;  %p964_p6 = scmp.lt.u32.totalorder %s960_s30, %s1403_s7 }
 0x2fc   :  { %p966_p7 = pnand %p964_p6, %p961_p5 }
 0x2fe   :  { %969 = shalt.err (!%p966_p7)
}
 0x2ff   :  { %663 = dma.vmem_to_hbm [thread:$0]  %s661_s26, 16, %s1403_s7, [#allocation4]  }
 0x300   :  { %970 = dma.done.wait [#allocation4], 16  }
 0x301   :  { %971 = vsyncadd [#allocation4], 4294967280 }
 0x302   :  { %667 = vsyncpa [#allocation4], 1 }

</bundles_post_ra>
